<compile_context>
chip_gen: v7x
topology: tpu7x:2x2x1
jax: 0.10.0
libtpu: 0.0.40
codegen_flags: <defaults>
</compile_context>

<pallas_src>
import numpy as np
import jax
import jax.numpy as jnp
from jax.experimental import pallas as pl
from jax.experimental.pallas import tpu as pltpu


def _glm_kernel(xt_ref, w_ref, b_ref, o_ref):
    # xt_ref: (D, TILE_N)  features on sublanes, time/batch samples on lanes
    # w_ref : (D, TILE_N)  weight column pre-broadcast along lanes (resident)
    # b_ref : (1,) SMEM    linear.bias
    # o_ref : (1, TILE_N)  lane-dense output row
    z = jnp.sum(xt_ref[...] * w_ref[...], axis=0, keepdims=True) + b_ref[0]
    o_ref[...] = jax.nn.sigmoid(z)


def _choose_tile_n(N, *, target_steps=16, min_tile=512, max_tile=8192):
    """Lane-aligned tile: big enough to hide per-step overhead, small enough to
    keep >= ~target_steps grid steps (v7x 2-TC split / pipeline depth)."""
    t = int(pl.cdiv(int(pl.cdiv(N, target_steps)), 128)) * 128
    t = max(t, min_tile)
    t = min(t, max_tile)
    t = min(t, int(pl.cdiv(N, 128)) * 128)   # never wider than lane-rounded N
    return max(t, 128)


def glm_forward_feature_major(Xt, W, b, *, tile_n=None):
    """sigmoid(Xt.T @ W.T + b) for feature-major Xt of shape (D, N).

    Xt: (D, N) float32, W: (1, D) float32 (nn.Linear weight), b: (1,) float32.
    Returns (N, 1) float32, matching the PyTorch module's forward().
    """
    D, N = Xt.shape
    if tile_n is None:
        tile_n = _choose_tile_n(N)
    tile_n = int(tile_n)
    grid = (int(pl.cdiv(N, tile_n)),)

    Xt = Xt.astype(jnp.float32)
    wb = jnp.broadcast_to(W.astype(jnp.float32).reshape(1, D).T, (D, tile_n))
    b = b.astype(jnp.float32).reshape(1)

    # VMEM: double-buffered Xt tile + resident weight block + output, + slack.
    x_tile_bytes = D * tile_n * 4
    vmem_need = 2 * x_tile_bytes + x_tile_bytes + 2 * tile_n * 4 + (2 << 20)
    vmem_limit = int(min(max(vmem_need, 16 << 20), 64 << 20))

    out_row = pl.pallas_call(
        _glm_kernel,
        out_shape=jax.ShapeDtypeStruct((1, N), jnp.float32),
        grid_spec=pltpu.PrefetchScalarGridSpec(
            num_scalar_prefetch=0,
            grid=grid,
            in_specs=[
                pl.BlockSpec((D, tile_n), lambda i: (0, i)),          # Xt tile
                pl.BlockSpec((D, tile_n), lambda i: (0, 0)),          # weights (resident)
                pl.BlockSpec(memory_space=pltpu.MemorySpace.SMEM),    # bias
            ],
            out_specs=pl.BlockSpec((1, tile_n), lambda i: (0, i)),
        ),
        compiler_params=pltpu.CompilerParams(
            dimension_semantics=("parallel",),
            vmem_limit_bytes=vmem_limit),
    )(Xt, wb, b)

    return out_row.reshape(N, 1)


def glm_forward(X, W, b, *, tile_n=None, min_pallas_n=1024):
    """PyTorch-semantics entry: X is (N, D); returns sigmoid(X @ W.T + b) as (N, 1)."""
    N, D = X.shape
    if N < min_pallas_n:
        # At this size the work is a few tens of KB; pallas_call launch +
        # relayout overhead swamps any kernel gain on every TPU generation.
        return jax.nn.sigmoid(X.astype(jnp.float32) @ W.astype(jnp.float32).T
                              + b.astype(jnp.float32).reshape(1))
    # NOTE: producers that can emit X feature-major (D, N) should call
    # glm_forward_feature_major directly and skip this extra HBM pass.
    return glm_forward_feature_major(X.astype(jnp.float32).T, W, b, tile_n=tile_n)


if __name__ == "__main__":
    # --- module configuration (consistent with __init__, 'neurons' mode) ----
    group_names = ["dPAG", "vPAG"]
    n_neurons_per_group = [3, 5]
    n_sessions = 2
    n_neurons = int(np.sum(n_neurons_per_group))          # 8
    n_synapses = n_sessions * n_neurons                   # 16 = linear in_features
    D = n_synapses
    N = 3000    # time bins: multi-step grid + partial (masked) last tile

    # --- deterministic parameters & inputs ----------------------------------
    key = jax.random.PRNGKey(0)
    kx, kw, kb = jax.random.split(key, 3)
    Xt = jax.random.normal(kx, (D, N), dtype=jnp.float32)        # feature-major (no wrapper transpose)
    W = 0.1 * jax.random.normal(kw, (1, D), dtype=jnp.float32)   # linear.weight
    b = 0.1 * jax.random.normal(kb, (1,), dtype=jnp.float32)     # linear.bias

    # --- run Pallas kernel (feature-major fast path) -------------------------
    out = jax.block_until_ready(glm_forward_feature_major(Xt, W, b))

    # --- correctness check vs pure-JAX reference -----------------------------
    ref = jax.block_until_ready(jax.nn.sigmoid(Xt.T @ W.T + b))  # (N, 1)
    np.testing.assert_allclose(np.asarray(out), np.asarray(ref), rtol=1e-5, atol=1e-6)
    assert out.shape == (N, 1) and out.dtype == jnp.float32

    # --- also exercise the PyTorch-signature entry (small-N XLA fallback) ----
    X_small = jax.random.normal(jax.random.PRNGKey(1), (300, D), dtype=jnp.float32)
    out_small = jax.block_until_ready(glm_forward(X_small, W, b))
    ref_small = jax.nn.sigmoid(X_small @ W.T + b)
    np.testing.assert_allclose(np.asarray(out_small), np.asarray(ref_small),
                               rtol=1e-5, atol=1e-6)

    print("KERNEL_OK")
</pallas_src>

<mosaic_0001>
module attributes {stable_mosaic.version = 11 : i64} {
  func.func @_glm_kernel(%arg0: i32, %arg1: memref<16x512xf32, #tpu.memory_space<vmem>>, %arg2: memref<16x512xf32, #tpu.memory_space<vmem>>, %arg3: memref<1xf32, #tpu.memory_space<smem>>, %arg4: memref<1x512xf32, #tpu.memory_space<vmem>>) attributes {dimension_semantics = [#tpu.dimension_semantics<parallel>], iteration_bounds = array<i64: 6>, scalar_prefetch = 0 : i64, scratch_operands = 0 : i64, tpu.core_type = #tpu.core_type<tc>, window_params = [{transform_indices = @transform_0, window_bounds = array<i64: 16, 512>}, {pipeline_mode = #tpu.pipeline_mode<synchronous>, transform_indices = @transform_1, window_bounds = array<i64: 16, 512>}, {transform_indices = @transform_2, window_bounds = array<i64: 1>}, {transform_indices = @transform_3, window_bounds = array<i64: 1, 512>}]} {
    %c0 = arith.constant 0 : index
    %c0_0 = arith.constant 0 : index
    %0 = vector.load %arg1[%c0, %c0_0] : memref<16x512xf32, #tpu.memory_space<vmem>>, vector<16x512xf32>
    %c0_1 = arith.constant 0 : index
    %c0_2 = arith.constant 0 : index
    %1 = vector.load %arg2[%c0_1, %c0_2] : memref<16x512xf32, #tpu.memory_space<vmem>>, vector<16x512xf32>
    %2 = arith.mulf %0, %1 : vector<16x512xf32>
    %cst = arith.constant dense<0.000000e+00> : vector<512xf32>
    %3 = vector.multi_reduction <add>, %2, %cst [0] : vector<16x512xf32> to vector<512xf32>
    %4 = vector.shape_cast %3 : vector<512xf32> to vector<1x512xf32>
    %c0_3 = arith.constant 0 : index
    %5 = memref.load %arg3[%c0_3] : memref<1xf32, #tpu.memory_space<smem>>
    %6 = vector.broadcast %5 : f32 to vector<1x512xf32>
    %7 = arith.addf %4, %6 : vector<1x512xf32>
    %8 = arith.negf %7 : vector<1x512xf32>
    %9 = math.exp %8 : vector<1x512xf32>
    %cst_4 = arith.constant 1.000000e+00 : f32
    %10 = vector.broadcast %cst_4 : f32 to vector<1x512xf32>
    %11 = arith.addf %10, %9 : vector<1x512xf32>
    %12 = arith.divf %10, %11 : vector<1x512xf32>
    %c0_5 = arith.constant 0 : index
    %c0_6 = arith.constant 0 : index
    %13 = vector.load %arg4[%c0_5, %c0_6] : memref<1x512xf32, #tpu.memory_space<vmem>>, vector<1x512xf32>
    tpu.vector_store %arg4[%c0_5, %c0_6], %12 {strides = array<i32>} : memref<1x512xf32, #tpu.memory_space<vmem>>, vector<1x512xf32>,
    return
  }
  func.func @transform_0(%arg0: i32) -> (i32, i32) {
    %c0_i32 = arith.constant 0 : i32
    %c0_i32_0 = arith.constant 0 : i32
    return %c0_i32, %arg0 : i32, i32
  }
  func.func @transform_1(%arg0: i32) -> (i32, i32) {
    %c0_i32 = arith.constant 0 : i32
    %c0_i32_0 = arith.constant 0 : i32
    %c0_i32_1 = arith.constant 0 : i32
    return %c0_i32, %c0_i32_0 : i32, i32
  }
  func.func @transform_2(%arg0: i32) -> i32 {
    %c0_i32 = arith.constant 0 : i32
    %c0_i32_0 = arith.constant 0 : i32
    return %c0_i32 : i32
  }
  func.func @transform_3(%arg0: i32) -> (i32, i32) {
    %c0_i32 = arith.constant 0 : i32
    %c0_i32_0 = arith.constant 0 : i32
    return %c0_i32, %arg0 : i32, i32
  }
}

</mosaic_0001>

<bundles_post_ra>
// kernel: tpu_custom_call.1
= control target key start
LH: loop header
LB: loop body
LE: loop exit
PB: predicated region body
PF: predicated region fallthrough
CT: control target
= control target key end

     0   :  { %s879_s0 = inlined_call_operand.hbm [shape: f32[16,3000], index: 0, kind: input, shape index: {}]   ;;  %s880_s1 = inlined_call_operand.hbm [shape: f32[16,512], index: 1, kind: input, shape index: {}]   ;;  %s881_s2 = inlined_call_operand.<no memory space> [shape: f32[1], index: 2, kind: input, shape index: {}]   ;;  %s882_s3 = inlined_call_operand.hbm [shape: f32[1,3000], index: 3, kind: output, shape index: {}]  }
   0x1   :  { %8 = sst [smem:[#allocation2]] %s881_s2 }
   0x2   :  { %9 = vsyncpa [#allocation4], 0 }
   0x3   :  { %11 = vsyncpa [#allocation4 + $0x1], 0 }
   0x4   :  { %12 = vsyncpa [#allocation7], 0 }
   0x5   :  { %13 = vsyncpa [#allocation5], 0 }
   0x6   :  { %15 = vsyncpa [#allocation5 + $0x1], 0  ;;  %s677_s14 = smov 0   ;;  %s679_s15 = smov 0  }
   0x7   :  { %s681_s16 = smov 0   ;;  %s683_s17 = smov 0  }
   0x8 LB: > { %s698_s2 = sadd.s32 4294967295, %s645_s17   ;;  %s418_s18 = sadd.s32 4294967294, %s645_s17   ;;  %s645_s17 = sphi %s683_s17, %s905_s17   ;;  %s641_s16 = sphi %s681_s16, %s904_s16   ;;  %s637_s15 = sphi %s679_s15, %s903_s15   ;;  %s633_s14 = sphi %s677_s14, %s902_s14  }
   0x9   : > { %s702_s19 = sadd.s32 1, %s645_s17   ;;  %s28_s20 = sadd.s32 1, %s641_s16 }
   0xa   : > { %s25_s21 = ssub.s32 %s645_s17, %s702_s19  ;;  %p35_p0 = scmp.ne.s32.totalorder %s641_s16, %s637_s15 }
   0xb   : > { %p26_p1 = scmp.eq.s32.totalorder %s25_s21, 0  ;;  %p36_p2 = scmp.eq.s32.totalorder %s645_s17, 0 }
   0xc   : > { %p41_p3 = scmp.ne.s32.totalorder %s637_s15, %s633_s14  ;;  %p883_p4 = scmp.eq.s32.totalorder %s698_s2, 0 }
   0xd   : > { %s714_s22 = scalar_select %p26_p1, %s641_s16, %s28_s20  }
   0xe   : > { %p716_p5 = por %p36_p2, %p35_p0  ;;  %p722_p6 = por %p883_p4, %p41_p3 }
   0xf   : > { %p107_p7 = scmp.eq.s32.totalorder %s698_s2, 5  ;;  %p113_p8 = scmp.eq.s32.totalorder %s418_s18, 5 }
  0x10   : > { %s887_s23 = scalar_select %p716_p5, 1, 0 }
  0x11   : > { %s888_s24 = scalar_select %p722_p6, 1, 0 }
  0x12   : > { %p419_p9 = scmp.ge.s32.totalorder %s645_s17, 1  ;;  %p120_p10 = scmp.lt.s32.totalorder %s645_s17, 7 }
  0x13   : > { %p729_p11 = por %p107_p7, %p35_p0  ;;  %p733_p12 = por %p113_p8, %p41_p3 }
  0x14   : > { %p737_p13 = pnand %p419_p9, %p120_p10  ;;  %s647_s28 = smov [#allocation6]  }
  0x15   : > { %s889_s25 = scalar_select %p729_p11, 1, 0 }
  0x16   : > { %s890_s26 = scalar_select %p733_p12, 1, 0 }
  0x17   : > { %s891_s27 = scalar_select %p737_p13, 1, 0 }
  0x18   : > { %p448_p1 = pneg %p737_p13  ;;  %s132_s29 = sshll.u32 %s647_s28, 4  ;;  %s133_s29 = int_to_ptr.vmem [resolvable:$true] %s132_s29 }
  0x19   : > { %s149_s4 = sand.u32 1, %s641_s16   ;;  %s517_s7 = scalar_lea.hbm %s880_s1, 1024 }
  0x1a   : > { %p745_p2 = pnand %p448_p1, %p883_p4  ;;  %p518_p3 = scmp.ne.s32.totalorder %s880_s1, %s517_s7 }
  0x1b   : > { %p524_p10 = scmp.lt.u32.totalorder %s517_s7, %s880_s1 }
  0x1c   : > { %p519_p7 = pneg %p745_p2 }
  0x1e   : > { %p520_p8 = pnand %p519_p7, %p518_p3 }
  0x20   : > { %p521_p9 = pneg %p520_p8 }
  0x22   : > { %p526_p1 = pnand %p524_p10, %p521_p9 }
  0x24   : > { %529 = shalt.err (!%p526_p1)
}
  0x25   : > { %s530_s12 = scalar_lea.vmem %s133_s29, 1024  ;;  %p538_p11 = scmp.lt.s32.totalorder %s133_s29, %s133_s29 }
  0x26   : > { %p531_p4 = scmp.ne.s32.totalorder %s133_s29, %s530_s12  ;;  %p539_p6 = scmp.lt.s32.totalorder %s530_s12, %s530_s12 }
  0x28   : > { %p533_p0 = pnand %p531_p4, %p519_p7  ;;  %p540_p13 = por %p539_p6, %p538_p11 }
  0x2a   : > { %p534_p12 = pneg %p533_p0 }
  0x2c   : > { %p541_p5 = pnand %p540_p13, %p534_p12 }
  0x2e   : > { %544 = shalt.err (!%p541_p5)
}
  0x2f   : > { %s648_s13 = smov 512   ;;  %s649_s18 = smov 32  }
  0x30   : > { %451 = dma.hbm_to_vmem [thread:$0]  (!%p745_p2), %s880_s1, 1024, %s133_s29, [#allocation7], %s648_s13, %s648_s13, %s649_s18  }
  0x31   : > { %p893_p4 = scmp.ne.s32.totalorder %s887_s23, 0  ;;  %p894_p0 = scmp.lt.s32.totalorder %s645_s17, 6 }
  0x32   : > { %s422_s5 = sshll.u32 %s149_s4, 6  ;;  %s438_s6 = sshll.u32 %s645_s17, 9 }
  0x33   : > { %p774_p3 = pnand %p894_p0, %p893_p4  ;;  %s782_s30 = scalar_lea.hbm %s879_s0, %s438_s6 }
  0x34   : > { %s153_s29 = scalar_lea.vmem [#allocation3], %s422_s5  ;;  %s786_s9 = scalar_lea.sflag [#allocation4], %s149_s4 }
  0x35   : > { %s160_s23 = sshll.u32 %s153_s29, 4  ;;  %s545_s10 = scalar_lea.hbm %s782_s30, 1024  ;;  %s784_s23 = int_to_ptr.vmem [resolvable:$true] %s160_s23 }
  0x36   : > { %p546_p5 = scmp.ne.s32.totalorder %s782_s30, %s545_s10  ;;  %p547_p6 = pneg %p774_p3 }
  0x37   : > { %s550_s20 = scalar_lea.hbm %s879_s0, 6144  ;;  %p551_p13 = scmp.lt.u32.totalorder %s782_s30, %s879_s0 }
  0x38   : > { %p548_p11 = pnand %p547_p6, %p546_p5  ;;  %p552_p2 = scmp.lt.u32.totalorder %s550_s20, %s545_s10 }
  0x39   : > { %p554_p8 = scmp.lt.u32.totalorder %s545_s10, %s782_s30 }
  0x3a   : > { %p549_p12 = pneg %p548_p11  ;;  %p553_p7 = por %p552_p2, %p551_p13 }
  0x3c   : > { %p555_p9 = por %p554_p8, %p553_p7 }
  0x3e   : > { %p556_p10 = pnand %p555_p9, %p549_p12 }
  0x40   : > { %559 = shalt.err (!%p556_p10)
}
  0x41   : > { %s560_s4 = scalar_lea.vmem %s784_s23, 1024  ;;  %s650_s5 = smov [#allocation3]  }
  0x42   : > { %p561_p1 = scmp.ne.s32.totalorder %s784_s23, %s560_s4  ;;  %s565_s7 = sshll.u32 %s650_s5, 4  ;;  %s566_s7 = int_to_ptr.vmem [resolvable:$false] %s565_s7 }
  0x43   : > { %s567_s8 = scalar_lea.vmem %s566_s7, 2048  ;;  %p568_p5 = scmp.lt.s32.totalorder %s784_s23, %s566_s7 }
  0x44   : > { %p563_p4 = pnand %p561_p1, %p547_p6  ;;  %p569_p11 = scmp.lt.s32.totalorder %s567_s8, %s560_s4 }
  0x46   : > { %p564_p0 = pneg %p563_p4  ;;  %p570_p13 = por %p569_p11, %p568_p5 }
  0x48   : > { %p571_p2 = pnand %p570_p13, %p564_p0 }
  0x4a   : > { %574 = shalt.err (!%p571_p2)
}
  0x4b   : > { %s651_s29 = smov 3072   ;;  %p896_p6 = scmp.ne.s32.totalorder %s891_s27, 0 }
  0x4c   : > { %455 = dma.hbm_to_vmem [thread:$0]  (!%p774_p3), %s782_s30, 1024, %s784_s23, %s786_s9, %s651_s29, %s648_s13, %s649_s18  }
  0x4d   : > { %172 = sbr.rel (%p896_p6) target bundleno = 162 (0xa2), region = 32  ;;  %s819_s10 = sand.u32 (!%p896_p6), 1, %s637_s15  }
  0x4e   : > { %s426_s11 = sshll.u32 (!%p896_p6), %s819_s10, 6  ;;  %s175_s12 = scalar_lea.sflag (!%p896_p6), [#allocation4], %s819_s10 }
  0x4f   : > { %s178_s20 = scalar_lea.vmem (!%p896_p6), [#allocation3], %s426_s11  ;;  %p897_p12 = scmp.ne.s32.totalorder (!%p896_p6), %s888_s24, 0 }
  0x54   : > { %620 = dma.done.wait (%p897_p12), %s175_s12, 1024  }
  0x55   : > { %622 = vsyncadd (%p897_p12), %s175_s12, 4294966272  ;;  %p898_p7 = scmp.eq.s32.totalorder %s698_s2, 0 }
  0x57   : > { %624 = dma.done.wait (%p898_p7), [#allocation7], 1024   ;;  %p899_p3 = pmov %p898_p7 }
  0x58   : > { %v207_v0 = vld [vmem:[%s178_s20] sm:$0xff]  ;;  %v208_v1 = vld [vmem:[%s178_s20 + $0x8] sm:$0xff]  ;;  %v209_v2 = vld [vmem:[%s178_s20 + $0x10] sm:$0xff]  ;;  %s259_s24 = sld [smem:[#allocation2]]  ;;  %s428_s27 = sshll.u32 %s819_s10, 2 }
  0x59   : > { %626 = vsyncadd (%p899_p3), [#allocation7], 4294966272  ;;  %v210_v3 = vld [vmem:[%s178_s20 + $0x18] sm:$0xff]  ;;  %v211_v4 = vld [vmem:[%s178_s20 + $0x20] sm:$0xff]  ;;  %s204_s13 = scalar_lea.vmem [#allocation8], %s428_s27  ;;  %s439_s28 = sshll.u32 %s698_s2, 6 }
  0x5a   : > { %v212_v5 = vld [vmem:[%s178_s20 + $0x28] sm:$0xff]  ;;  %v213_v6 = vld [vmem:[%s178_s20 + $0x30] sm:$0xff]  ;;  %v214_v7 = vld [vmem:[%s178_s20 + $0x38] sm:$0xff]  ;;  %s338_s18 = sshll.u32 %s204_s13, 4  ;;  %s838_s9 = scalar_lea.hbm %s882_s3, %s439_s28  ;;  %s833_s18 = int_to_ptr.vmem [resolvable:$true] %s338_s18 }
  0x5b   : > { %v215_v8 = vld [vmem:[#allocation6] sm:$0xff]  ;;  %v216_v9 = vld [vmem:[#allocation6 + $0x8] sm:$0xff]  ;;  %v217_v10 = vld [vmem:[#allocation6 + $0x10] sm:$0xff]  ;;  %s324_s21 = scalar_lea.sflag [#allocation5], %s819_s10  ;;  %s575_s6 = scalar_lea.vmem %s833_s18, 64 }
  0x5c   : > { %v218_v11 = vld [vmem:[#allocation6 + $0x18] sm:$0xff]  ;;  %v223_v12 = vmul.f32 %v215_v8, %v207_v0  ;;  %v219_v13 = vld [vmem:[#allocation6 + $0x20] sm:$0xff]  ;;  %v220_v14 = vld [vmem:[#allocation6 + $0x28] sm:$0xff]  ;;  %v224_v16 = vmul.f32 %v216_v9, %v208_v1  ;;  %v225_v17 = vmul.f32 %v217_v10, %v209_v2  ;;  %p576_p8 = scmp.ne.s32.totalorder %s833_s18, %s575_s6  ;;  %p900_p9 = scmp.ne.s32.totalorder %s889_s25, 0 }
  0x5d   : > { %v221_v15 = vld [vmem:[#allocation6 + $0x30] sm:$0xff]  ;;  %v226_v18 = vmul.f32 %v218_v11, %v210_v3  ;;  %v222_v19 = vld [vmem:[#allocation6 + $0x38] sm:$0xff]  ;;  %v227_v20 = vmul.f32 %v219_v13, %v211_v4  ;;  %v228_v21 = vmul.f32 %v220_v14, %v212_v5  ;;  %v652_v5 = vmov 1966171168   ;;  %s653_s2 = smov [#allocation8]  }
  0x5e   : > { %v229_v22 = vmul.f32 %v221_v15, %v213_v6  ;;  %v230_v23 = vmul.f32 %v222_v19, %v214_v7  ;;  %v260_v48 = vstv %s259_s24  ;;  %v296_v6 = vunpack.c.l.s4 %v652_v5  ;;  %p577_p10 = pnand %p576_p8, %p900_p9  ;;  %s579_s4 = sshll.u32 %s653_s2, 4  ;;  %s580_s4 = int_to_ptr.vmem [resolvable:$false] %s579_s4 }
  0x5f   : > { %v231_v24 = vadd.f32 %v227_v20, %v223_v12  ;;  %v238_v25 = vadd.f32 %v228_v21, %v224_v16  ;;  %v298_v7 = vlaneseq  ;;  %s581_s5 = scalar_lea.vmem %s580_s4, 128  ;;  %p582_p4 = scmp.lt.s32.totalorder %s833_s18, %s580_s4 }
  0x60   : > { %v245_v26 = vadd.f32 %v229_v22, %v225_v17  ;;  %v252_v27 = vadd.f32 %v230_v23, %v226_v18  ;;  %v297_v8 = vunpack.c.0.s8 %v296_v6  ;;  %p578_p1 = pneg %p577_p10  ;;  %p583_p0 = scmp.lt.s32.totalorder %s581_s5, %s575_s6 }
  0x61   : > { %v232_v28 = vrot.slane %v231_v24, 4  ;;  %v239_v29 = vrot.slane %v238_v25, 4  ;;  %v299_v9 = vshrl.u32 %v298_v7, 7  ;;  %vm320_vm0 = vcmp.lt.s32.totalorder %v298_v7, 512 }
  0x62   : > { %v246_v30 = vrot.slane %v245_v26, 4  ;;  %v253_v31 = vrot.slane %v252_v27, 4  ;;  %p584_p5 = por %p583_p0, %p582_p4 }
  0x63   : > { %v233_v32 = vadd.f32 %v232_v28, %v231_v24  ;;  %v240_v33 = vadd.f32 %v239_v29, %v238_v25  ;;  %v300_v11 = vsub.s32 %v297_v8, %v299_v9 }
  0x64   : > { %v247_v34 = vadd.f32 %v246_v30, %v245_v26  ;;  %v254_v35 = vadd.f32 %v253_v31, %v252_v27  ;;  %p585_p11 = pnand %p584_p5, %p578_p1 }
  0x65   : > { %v234_v36 = vrot.slane %v233_v32, 2  ;;  %v241_v37 = vrot.slane %v240_v33, 2 }
  0x66   : > { %v248_v38 = vrot.slane %v247_v34, 2  ;;  %v255_v39 = vrot.slane %v254_v35, 2 }
  0x67   : > { %v235_v40 = vadd.f32 %v234_v36, %v233_v32  ;;  %v242_v41 = vadd.f32 %v241_v37, %v240_v33 }
  0x68   : > { %v249_v42 = vadd.f32 %v248_v38, %v247_v34  ;;  %v256_v43 = vadd.f32 %v255_v39, %v254_v35 }
  0x69   : > { %v236_v44 = vrot.slane %v235_v40, 1  ;;  %v243_v45 = vrot.slane %v242_v41, 1 }
  0x6a   : > { %v250_v46 = vrot.slane %v249_v42, 1  ;;  %v257_v47 = vrot.slane %v256_v43, 1 }
  0x6b   : > { %v237_v49 = vadd.f32 %v236_v44, %v235_v40  ;;  %v244_v50 = vadd.f32 %v243_v45, %v242_v41 }
  0x6c   : > { %v251_v51 = vadd.f32 %v250_v46, %v249_v42  ;;  %v258_v52 = vadd.f32 %v257_v47, %v256_v43 }
  0x6d   : > { %v261_v53 = vadd.f32 %v260_v48, %v237_v49  ;;  %v262_v54 = vadd.f32 %v260_v48, %v244_v50 }
  0x6e   : > { %v263_v55 = vadd.f32 %v260_v48, %v251_v51  ;;  %v264_v56 = vadd.f32 %v260_v48, %v258_v52 }
  0x6f   : > { %v429_v57 = vmul.f32 -1.442695, %v261_v53  ;;  %v430_v58 = vmul.f32 -1.442695, %v262_v54 }
  0x70   : > { %v431_v59 = vmul.f32 -1.442695, %v263_v55  ;;  %v432_v60 = vmul.f32 -1.442695, %v264_v56 }
  0x71   : > { %501 = vpow2.f32 %v429_v57 }
  0x72   : > { %503 = vpow2.f32 %v430_v58 }
  0x73   : > { %505 = vpow2.f32 %v431_v59 }
  0x74   : > { %507 = vpow2.f32 %v432_v60 }
  0x7b   : > { %v502_v61 = vpop.eup %501 }
  0x7c   : > { %v504_v62 = vpop.eup %503  ;;  %v277_v63 = vadd.f32 1.0, %v502_v61 }
  0x7d   : > { %v506_v0 = vpop.eup %505  ;;  %v278_v1 = vadd.f32 1.0, %v504_v62 }
  0x7e   : > { %v508_v2 = vpop.eup %507  ;;  %v279_v3 = vadd.f32 1.0, %v506_v0  ;;  %509 = vrcp.f32 %v277_v63 }
  0x7f   : > { %v280_v4 = vadd.f32 1.0, %v508_v2  ;;  %511 = vrcp.f32 %v278_v1 }
  0x80   : > { %513 = vrcp.f32 %v279_v3 }
  0x81   : > { %515 = vrcp.f32 %v280_v4 }
  0x88   : > { %v510_v10 = vpop.eup %509 }
  0x89   : > { %v512_v12 = vpop.eup %511 }
  0x8a   : > { %v514_v13 = vpop.eup %513  ;;  %v293_v14 = vcombine.low %v510_v10, %v512_v12 }
  0x8b   : > { %v516_v15 = vpop.eup %515 }
  0x8c   : > { %v294_v16 = vcombine.low %v514_v13, %v516_v15  ;;  %v301_v17 = vrot.slane %v293_v14, %v300_v11 }
  0x8e   : > { %v308_v18 = vrot.slane %v294_v16, %v300_v11 }
  0x90   : > { %v309_v19 = vcombine.low %v301_v17, %v308_v18 }
  0x92   : > { %v316_v20 = vrot.slane %v309_v19, %v300_v11 }
  0x94   : > { %322 = vst.msk [vmem:[%s204_s13] sm:$0xf] %vm320_vm0, %v316_v20 }
  0x95   : > { %588 = shalt.err (!%p585_p11)
}
  0x96   : > { %s589_s7 = scalar_lea.hbm %s838_s9, 64  ;;  %s593_s10 = scalar_lea.hbm %s882_s3, 384 }
  0x97   : > { %p590_p13 = scmp.ne.s32.totalorder %s838_s9, %s589_s7  ;;  %p594_p12 = scmp.lt.u32.totalorder %s838_s9, %s882_s3 }
  0x98   : > { %p595_p7 = scmp.lt.u32.totalorder %s593_s10, %s589_s7  ;;  %p597_p8 = scmp.lt.u32.totalorder %s589_s7, %s838_s9 }
  0x99   : > { %p591_p2 = pnand %p590_p13, %p900_p9 }
  0x9a   : > { %p596_p3 = por %p595_p7, %p594_p12 }
  0x9b   : > { %p592_p6 = pneg %p591_p2 }
  0x9c   : > { %p598_p10 = por %p597_p8, %p596_p3 }
  0x9e   : > { %p599_p1 = pnand %p598_p10, %p592_p6 }
  0xa0   : > { %602 = shalt.err (!%p599_p1)
}
  0xa1   : > { %446 = dma.vmem_to_hbm [thread:$0]  (%p900_p9), %s833_s18, 64, %s838_s9, %s324_s21  }
  0xa2 PF: > { %p463_p4 = scmp.ge.s32.totalorder %s645_s17, 2  ;;  %s350_s20 = sand.u32 1, %s633_s14  }
  0xa3   : > { %p901_p0 = scmp.ne.s32.totalorder %s890_s26, 0  ;;  %s351_s24 = scalar_lea.sflag [#allocation5], %s350_s20 }
  0xa5   : > { %p457_p5 = pnand %p463_p4, %p901_p0 }
  0xa7   : > { %628 = dma.done.wait (!%p457_p5), %s351_s24, 64  }
  0xa8   : > { %630 = vsyncadd (!%p457_p5), %s351_s24, 4294967232  ;;  %p18_p11 = scmp.ge.s32.totalorder %s702_s19, 8   ;;  %s902_s14 = smov %s637_s15 }
  0xa9   : > { %s903_s15 = smov %s641_s16  ;;  %s904_s16 = smov %s714_s22 }
  0xaa   : > { %s905_s17 = smov %s702_s19  ;;  %20 = sbr.rel (!%p18_p11) target bundleno = 8 (0x8), region = 81 }
  0xb1   :  { %356 = vsyncpa [#allocation4], 1 }
  0xb2   :  { %358 = vsyncpa [#allocation4 + $0x1], 1 }
  0xb3   :  { %359 = vsyncpa [#allocation7], 1 }
  0xb4   :  { %360 = vsyncpa [#allocation5], 1 }
  0xb5   :  { %362 = vsyncpa [#allocation5 + $0x1], 1 }

</bundles_post_ra>
